<compile_context>
chip_gen: v7x
topology: tpu7x:2x2x1
jax: 0.10.0
libtpu: 0.0.40
codegen_flags: <defaults>
</compile_context>

<pallas_src>
import jax
import jax.numpy as jnp
from jax.experimental import pallas as pl
from jax.experimental.pallas import tpu as pltpu

IN_DIM = 784
HID_DIM = 32
OUT_DIM = 10
TB_DEFAULT = 1024            # batch tile (rows of x per grid step)
VMEM_LIMIT_BYTES = 48 * 1024 * 1024


def mlp_kernel(x_ref, w1_ref, b1_ref, w2_ref, b2_ref, o_ref):
    # Hidden layer: (TB, 784) @ (784, 32) + (1, 32), ReLU.  f32 accumulation.
    x = x_ref[...]
    h = jnp.dot(x, w1_ref[...], preferred_element_type=jnp.float32) + b1_ref[...]
    h = jnp.maximum(h, 0.0)
    # Output head: (TB, 32) @ (32, 10) + (1, 10).  True logits, no padding.
    o = jnp.dot(h, w2_ref[...], preferred_element_type=jnp.float32) + b2_ref[...]
    o_ref[...] = o.astype(o_ref.dtype)


def _cost_estimate(batch_rows, x_dtype):
    x_bytes = jnp.dtype(x_dtype).itemsize
    flops = 2 * batch_rows * IN_DIM * HID_DIM + 2 * batch_rows * HID_DIM * OUT_DIM
    bytes_accessed = (
        batch_rows * IN_DIM * x_bytes      # x in
        + batch_rows * OUT_DIM * 4         # logits out
        + IN_DIM * HID_DIM * x_bytes       # w1
        + HID_DIM * OUT_DIM * 4            # w2
        + (HID_DIM + OUT_DIM) * 4          # biases
    )
    return pl.CostEstimate(flops=flops, transcendentals=0,
                           bytes_accessed=bytes_accessed)


def relu_mlp1_forward(x, w1, b1, w2, b2, *, tb=TB_DEFAULT):
    """Forward pass of ReLU_MLP1.

    x:  anything reshapeable to (-1, 784)   (e.g. (B, 1, 28, 28) MNIST batches)
    w1: (32, 784), b1: (32,)   -- PyTorch fc1.weight / fc1.bias layout
    w2: (10, 32),  b2: (10,)   -- PyTorch fc2.weight / fc2.bias layout
    Returns (B, 10) float32 logits.
    """
    x2d = x.reshape(-1, IN_DIM)        # NO dtype cast: stream x at its HBM dtype
    B = x2d.shape[0]
    in_dtype = x2d.dtype

    # Weights as (in, out).  w1 matches x's dtype for the MXU; layer-2
    # weights/biases stay f32 (tiny, and h is accumulated in f32).
    w1_t = w1.T.astype(in_dtype)                   # (784, 32)
    b1_r = b1.reshape(1, -1).astype(jnp.float32)   # (1, 32)
    w2_t = w2.T.astype(jnp.float32)                # (32, 10)
    b2_r = b2.reshape(1, -1).astype(jnp.float32)   # (1, 10)

    if B <= tb:
        # Small batch: whole problem fits in VMEM; a grid would only add
        # per-step pipeline overhead.  Full-array blocks satisfy tiling rules
        # (block_shape == array shape).
        return pl.pallas_call(
            mlp_kernel,
            out_shape=jax.ShapeDtypeStruct((B, OUT_DIM), jnp.float32),
            in_specs=[
                pl.BlockSpec((B, IN_DIM), lambda: (0, 0)),
                pl.BlockSpec((IN_DIM, HID_DIM), lambda: (0, 0)),
                pl.BlockSpec((1, HID_DIM), lambda: (0, 0)),
                pl.BlockSpec((HID_DIM, OUT_DIM), lambda: (0, 0)),
                pl.BlockSpec((1, OUT_DIM), lambda: (0, 0)),
            ],
            out_specs=pl.BlockSpec((B, OUT_DIM), lambda: (0, 0)),
            cost_estimate=_cost_estimate(B, in_dtype),
        )(x2d, w1_t, b1_r, w2_t, b2_r)

    # Large batch (B > tb  =>  n_tiles >= 2, so both v7x TCs get work): tile
    # the batch dimension.  No row padding: Pallas masks the partial last
    # block on writeback, and nothing reduces over the batch in-kernel, so
    # garbage rows in the last input tile never reach HBM.
    n_tiles = pl.cdiv(B, tb)
    out = pl.pallas_call(
        mlp_kernel,
        out_shape=jax.ShapeDtypeStruct((B, OUT_DIM), jnp.float32),
        grid_spec=pltpu.PrefetchScalarGridSpec(
            num_scalar_prefetch=0,
            grid=(n_tiles,),
            in_specs=[
                pl.BlockSpec((tb, IN_DIM), lambda i: (i, 0)),        # stream x
                pl.BlockSpec((IN_DIM, HID_DIM), lambda i: (0, 0)),   # resident
                pl.BlockSpec((1, HID_DIM), lambda i: (0, 0)),        # resident
                pl.BlockSpec((HID_DIM, OUT_DIM), lambda i: (0, 0)),  # resident
                pl.BlockSpec((1, OUT_DIM), lambda i: (0, 0)),        # resident
            ],
            out_specs=pl.BlockSpec((tb, OUT_DIM), lambda i: (i, 0)),
        ),
        compiler_params=pltpu.CompilerParams(
            dimension_semantics=("parallel",),       # megacore sharding on v7x
            vmem_limit_bytes=VMEM_LIMIT_BYTES,       # headroom for tb up to ~2048 f32
        ),
        cost_estimate=_cost_estimate(B, in_dtype),
    )(x2d, w1_t, b1_r, w2_t, b2_r)
    return out


def init_params(key):
    """Deterministic init matching PyTorch Linear shapes & default U(-1/sqrt(fan_in))."""
    k1, k2, k3, k4 = jax.random.split(key, 4)
    bound1 = 1.0 / jnp.sqrt(float(IN_DIM))
    bound2 = 1.0 / jnp.sqrt(float(HID_DIM))
    w1 = jax.random.uniform(k1, (HID_DIM, IN_DIM), jnp.float32, -bound1, bound1)
    b1 = jax.random.uniform(k2, (HID_DIM,), jnp.float32, -bound1, bound1)
    w2 = jax.random.uniform(k3, (OUT_DIM, HID_DIM), jnp.float32, -bound2, bound2)
    b2 = jax.random.uniform(k4, (OUT_DIM,), jnp.float32, -bound2, bound2)
    return w1, b1, w2, b2


def _reference(x, w1, b1, w2, b2):
    x2d = x.reshape(-1, IN_DIM)
    return jnp.maximum(x2d @ w1.T + b1, 0.0) @ w2.T + b2


if __name__ == "__main__":
    key = jax.random.PRNGKey(0)
    k_params, k_x1, k_x2 = jax.random.split(key, 3)
    w1, b1, w2, b2 = init_params(k_params)

    # 1) Small MNIST-like batch -> single-block (no grid) path.
    x_small = jax.random.normal(k_x1, (8, 1, 28, 28), jnp.float32)
    out_small = jax.block_until_ready(relu_mlp1_forward(x_small, w1, b1, w2, b2))
    ref_small = _reference(x_small, w1, b1, w2, b2)
    assert out_small.shape == (8, OUT_DIM)
    assert jnp.allclose(out_small, ref_small, atol=1e-4, rtol=1e-4)

    # 2) Exercise the tiled/pipelined grid path (ragged tail, no jnp.pad:
    #    last block is a masked remainder) cheaply by forcing an 8-row tile
    #    on a 20-row batch.
    x_tiled = jax.random.normal(k_x2, (20, 1, 28, 28), jnp.float32)
    out_tiled = jax.block_until_ready(
        relu_mlp1_forward(x_tiled, w1, b1, w2, b2, tb=8))
    ref_tiled = _reference(x_tiled, w1, b1, w2, b2)
    assert out_tiled.shape == (20, OUT_DIM)
    assert jnp.allclose(out_tiled, ref_tiled, atol=1e-4, rtol=1e-4)

    print("KERNEL_OK")
</pallas_src>

<mosaic_0001>
module attributes {stable_mosaic.version = 11 : i64} {
  func.func @mlp_kernel(%arg0: memref<8x784xf32, #tpu.memory_space<vmem>>, %arg1: memref<784x32xf32, #tpu.memory_space<vmem>>, %arg2: memref<1x32xf32, #tpu.memory_space<vmem>>, %arg3: memref<32x10xf32, #tpu.memory_space<vmem>>, %arg4: memref<1x10xf32, #tpu.memory_space<vmem>>, %arg5: memref<8x10xf32, #tpu.memory_space<vmem>>) attributes {dimension_semantics = [], scalar_prefetch = 0 : i64, scratch_operands = 0 : i64, tpu.core_type = #tpu.core_type<tc>} {
    %c0 = arith.constant 0 : index
    %c0_0 = arith.constant 0 : index
    %0 = vector.load %arg0[%c0, %c0_0] : memref<8x784xf32, #tpu.memory_space<vmem>>, vector<8x784xf32>
    %c0_1 = arith.constant 0 : index
    %c0_2 = arith.constant 0 : index
    %1 = vector.load %arg1[%c0_1, %c0_2] : memref<784x32xf32, #tpu.memory_space<vmem>>, vector<784x32xf32>
    %cst = arith.constant dense<0.000000e+00> : vector<8x32xf32>
    %2 = tpu.matmul %0, %1, %cst {dimension_numbers = #tpu.dot_dimension_numbers<[1], [0], [0], [1], [0, 0, 1, 1], [], []>} : vector<8x784xf32>, vector<784x32xf32>, vector<8x32xf32> -> vector<8x32xf32>
    %c0_3 = arith.constant 0 : index
    %c0_4 = arith.constant 0 : index
    %3 = vector.load %arg2[%c0_3, %c0_4] : memref<1x32xf32, #tpu.memory_space<vmem>>, vector<1x32xf32>
    %4 = vector.broadcast %3 : vector<1x32xf32> to vector<8x32xf32>
    %5 = arith.addf %2, %4 : vector<8x32xf32>
    %cst_5 = arith.constant 0.000000e+00 : f32
    %6 = vector.broadcast %cst_5 : f32 to vector<8x32xf32>
    %7 = arith.maximumf %5, %6 : vector<8x32xf32>
    %c0_6 = arith.constant 0 : index
    %c0_7 = arith.constant 0 : index
    %8 = vector.load %arg3[%c0_6, %c0_7] : memref<32x10xf32, #tpu.memory_space<vmem>>, vector<32x10xf32>
    %cst_8 = arith.constant dense<0.000000e+00> : vector<8x10xf32>
    %9 = tpu.matmul %7, %8, %cst_8 {dimension_numbers = #tpu.dot_dimension_numbers<[1], [0], [0], [1], [0, 0, 1, 1], [], []>} : vector<8x32xf32>, vector<32x10xf32>, vector<8x10xf32> -> vector<8x10xf32>
    %c0_9 = arith.constant 0 : index
    %c0_10 = arith.constant 0 : index
    %10 = vector.load %arg4[%c0_9, %c0_10] : memref<1x10xf32, #tpu.memory_space<vmem>>, vector<1x10xf32>
    %11 = vector.broadcast %10 : vector<1x10xf32> to vector<8x10xf32>
    %12 = arith.addf %9, %11 : vector<8x10xf32>
    %c0_11 = arith.constant 0 : index
    %c0_12 = arith.constant 0 : index
    %13 = vector.load %arg5[%c0_11, %c0_12] : memref<8x10xf32, #tpu.memory_space<vmem>>, vector<8x10xf32>
    tpu.vector_store %arg5[%c0_11, %c0_12], %12 {strides = array<i32>} : memref<8x10xf32, #tpu.memory_space<vmem>>, vector<8x10xf32>,
    return
  }
}

</mosaic_0001>

<bundles_post_ra>
// kernel: tpu_custom_call.1
= control target key start
LH: loop header
LB: loop body
LE: loop exit
PB: predicated region body
PF: predicated region fallthrough
CT: control target
= control target key end

     0   :  { %s1169_s0 = inlined_call_operand.vmem [shape: f32[8,784], index: 0, kind: input, shape index: {}]   ;;  %s1170_s1 = inlined_call_operand.vmem [shape: f32[784,32], index: 1, kind: input, shape index: {}]   ;;  %s1171_s2 = inlined_call_operand.vmem [shape: f32[1,32], index: 2, kind: input, shape index: {}]   ;;  %s1172_s3 = inlined_call_operand.vmem [shape: f32[32,10], index: 3, kind: input, shape index: {}]   ;;  %s1173_s4 = inlined_call_operand.vmem [shape: f32[1,10], index: 4, kind: input, shape index: {}]   ;;  %s1174_s5 = inlined_call_operand.hbm [shape: f32[8,10], index: 5, kind: output, shape index: {}]  }
   0x1   :  { %v44_v0 = vld [vmem:[%s1170_s1 + $0x80] sm:$0xff]  ;;  %v45_v1 = vld [vmem:[%s1170_s1 + $0x88] sm:$0xff]  ;;  %v46_v11 = vld [vmem:[%s1170_s1 + $0x90] sm:$0xff] }
   0x2   :  { %v28_v2 = vld [vmem:[%s1170_s1] sm:$0xff]  ;;  %v654_v3 = vpack.c.bf16 %v45_v1, %v44_v0  ;;  %v29_v4 = vld [vmem:[%s1170_s1 + $0x8] sm:$0xff]  ;;  %v47_v13 = vld [vmem:[%s1170_s1 + $0x98] sm:$0xff] }
   0x3   :  { %v76_v5 = vld [vmem:[%s1170_s1 + $0x180] sm:$0xff]  ;;  %v77_v6 = vld [vmem:[%s1170_s1 + $0x188] sm:$0xff]  ;;  %v656_v7 = vpack.c.bf16 %v29_v4, %v28_v2  ;;  %v30_v14 = vld [vmem:[%s1170_s1 + $0x10] sm:$0xff]  ;;  %v658_v16 = vpack.c.bf16 %v47_v13, %v46_v11 }
   0x4   :  { %v686_v8 = vpack.c.bf16 %v77_v6, %v76_v5  ;;  %v60_v9 = vld [vmem:[%s1170_s1 + $0x100] sm:$0xff]  ;;  %v61_v10 = vld [vmem:[%s1170_s1 + $0x108] sm:$0xff]  ;;  %655 = vmatprep.subr.bf16.mxu0 %v654_v3  ;;  %v31_v15 = vld [vmem:[%s1170_s1 + $0x18] sm:$0xff] }
   0x5   :  { %v688_v12 = vpack.c.bf16 %v61_v10, %v60_v9  ;;  %657 = vmatpush3.bf16.msra.mxu0 %v656_v7  ;;  %v660_v17 = vpack.c.bf16 %v31_v15, %v30_v14  ;;  %v78_v18 = vld [vmem:[%s1170_s1 + $0x190] sm:$0xff]  ;;  %v79_v19 = vld [vmem:[%s1170_s1 + $0x198] sm:$0xff]  ;;  %v48_v23 = vld [vmem:[%s1170_s1 + $0xa0] sm:$0xff] }
   0x6   :  { %687 = vmatprep.subr.bf16.mxu1 %v686_v8  ;;  %v62_v20 = vld [vmem:[%s1170_s1 + $0x110] sm:$0xff]  ;;  %v690_v21 = vpack.c.bf16 %v79_v19, %v78_v18  ;;  %v63_v22 = vld [vmem:[%s1170_s1 + $0x118] sm:$0xff]  ;;  %v49_v24 = vld [vmem:[%s1170_s1 + $0xa8] sm:$0xff]  ;;  %659 = vmatprep.subr.bf16.mxu0 %v658_v16 }
   0x7   :  { %689 = vmatpush3.bf16.msra.mxu1 %v688_v12  ;;  %v692_v25 = vpack.c.bf16 %v63_v22, %v62_v20  ;;  %v662_v26 = vpack.c.bf16 %v49_v24, %v48_v23  ;;  %v32_v27 = vld [vmem:[%s1170_s1 + $0x20] sm:$0xff]  ;;  %v33_v28 = vld [vmem:[%s1170_s1 + $0x28] sm:$0xff]  ;;  %v50_v35 = vld [vmem:[%s1170_s1 + $0xb0] sm:$0xff] }
   0x8   :  { %v80_v29 = vld [vmem:[%s1170_s1 + $0x1a0] sm:$0xff]  ;;  %691 = vmatprep.subr.bf16.mxu1 %v690_v21  ;;  %v81_v30 = vld [vmem:[%s1170_s1 + $0x1a8] sm:$0xff]  ;;  %v664_v33 = vpack.c.bf16 %v33_v28, %v32_v27  ;;  %v51_v36 = vld [vmem:[%s1170_s1 + $0xb8] sm:$0xff] }
   0x9   :  { %v64_v31 = vld [vmem:[%s1170_s1 + $0x120] sm:$0xff]  ;;  %v65_v32 = vld [vmem:[%s1170_s1 + $0x128] sm:$0xff]  ;;  %661 = vmatpush3.bf16.msra.mxu0 %v660_v17  ;;  %v694_v34 = vpack.c.bf16 %v81_v30, %v80_v29  ;;  %v34_v37 = vld [vmem:[%s1170_s1 + $0x30] sm:$0xff]  ;;  %v666_v39 = vpack.c.bf16 %v51_v36, %v50_v35 }
   0xa   :  { %663 = vmatprep.subr.bf16.mxu0 %v662_v26  ;;  %v696_v38 = vpack.c.bf16 %v65_v32, %v64_v31  ;;  %v35_v40 = vld [vmem:[%s1170_s1 + $0x38] sm:$0xff]  ;;  %v82_v41 = vld [vmem:[%s1170_s1 + $0x1b0] sm:$0xff]  ;;  %v52_v46 = vld [vmem:[%s1170_s1 + $0xc0] sm:$0xff] }
   0xb   :  { %693 = vmatpush3.bf16.msra.mxu1 %v692_v25  ;;  %v83_v42 = vld [vmem:[%s1170_s1 + $0x1b8] sm:$0xff]  ;;  %v66_v44 = vld [vmem:[%s1170_s1 + $0x130] sm:$0xff]  ;;  %v53_v47 = vld [vmem:[%s1170_s1 + $0xc8] sm:$0xff]  ;;  %v668_v48 = vpack.c.bf16 %v35_v40, %v34_v37 }
   0xc   :  { %695 = vmatprep.subr.bf16.mxu1 %v694_v34  ;;  %v698_v43 = vpack.c.bf16 %v83_v42, %v82_v41  ;;  %v67_v45 = vld [vmem:[%s1170_s1 + $0x138] sm:$0xff]  ;;  %v84_v49 = vld [vmem:[%s1170_s1 + $0x1c0] sm:$0xff]  ;;  %v85_v50 = vld [vmem:[%s1170_s1 + $0x1c8] sm:$0xff]  ;;  %v670_v52 = vpack.c.bf16 %v53_v47, %v52_v46 }
   0xd   :  { %665 = vmatpush3.bf16.msra.mxu0 %v664_v33  ;;  %v700_v51 = vpack.c.bf16 %v67_v45, %v66_v44  ;;  %v36_v53 = vld [vmem:[%s1170_s1 + $0x40] sm:$0xff]  ;;  %v37_v54 = vld [vmem:[%s1170_s1 + $0x48] sm:$0xff]  ;;  %v702_v56 = vpack.c.bf16 %v85_v50, %v84_v49  ;;  %v54_v58 = vld [vmem:[%s1170_s1 + $0xd0] sm:$0xff]  ;;  %v787_v50 = vmov 0.0|0.0  }
   0xe   :  { %667 = vmatprep.subr.bf16.mxu0 %v666_v39  ;;  %v68_v55 = vld [vmem:[%s1170_s1 + $0x140] sm:$0xff]  ;;  %v69_v57 = vld [vmem:[%s1170_s1 + $0x148] sm:$0xff]  ;;  %v55_v59 = vld [vmem:[%s1170_s1 + $0xd8] sm:$0xff]  ;;  %v672_v62 = vpack.c.bf16 %v37_v54, %v36_v53 }
   0xf   :  { %697 = vmatpush3.bf16.msra.mxu1 %v696_v38  ;;  %v86_v60 = vld [vmem:[%s1170_s1 + $0x1d0] sm:$0xff]  ;;  %v87_v61 = vld [vmem:[%s1170_s1 + $0x1d8] sm:$0xff]  ;;  %v704_v63 = vpack.c.bf16 %v69_v57, %v68_v55  ;;  %v674_v0 = vpack.c.bf16 %v55_v59, %v54_v58  ;;  %v56_v6 = vld [vmem:[%s1170_s1 + $0xe0] sm:$0xff] }
  0x10   :  { %699 = vmatprep.subr.bf16.mxu1 %v698_v43  ;;  %v38_v1 = vld [vmem:[%s1170_s1 + $0x50] sm:$0xff]  ;;  %v39_v2 = vld [vmem:[%s1170_s1 + $0x58] sm:$0xff]  ;;  %v706_v4 = vpack.c.bf16 %v87_v61, %v86_v60  ;;  %v57_v7 = vld [vmem:[%s1170_s1 + $0xe8] sm:$0xff] }
  0x11   :  { %669 = vmatpush3.bf16.msra.mxu0 %v668_v48  ;;  %v70_v3 = vld [vmem:[%s1170_s1 + $0x150] sm:$0xff]  ;;  %v71_v5 = vld [vmem:[%s1170_s1 + $0x158] sm:$0xff]  ;;  %v88_v8 = vld [vmem:[%s1170_s1 + $0x1e0] sm:$0xff]  ;;  %v676_v10 = vpack.c.bf16 %v39_v2, %v38_v1  ;;  %v678_v14 = vpack.c.bf16 %v57_v7, %v56_v6 }
  0x12   :  { %671 = vmatprep.subr.bf16.mxu0 %v670_v52  ;;  %v89_v9 = vld [vmem:[%s1170_s1 + $0x1e8] sm:$0xff]  ;;  %v40_v11 = vld [vmem:[%s1170_s1 + $0x60] sm:$0xff]  ;;  %v708_v13 = vpack.c.bf16 %v71_v5, %v70_v3  ;;  %v58_v19 = vld [vmem:[%s1170_s1 + $0xf0] sm:$0xff] }
  0x13   :  { %701 = vmatpush3.bf16.msra.mxu1 %v700_v51  ;;  %v22_v12 = vld [vmem:[%s1169_s0 + $0x8] sm:$0xff]  ;;  %v72_v16 = vld [vmem:[%s1170_s1 + $0x160] sm:$0xff]  ;;  %v710_v18 = vpack.c.bf16 %v89_v9, %v88_v8  ;;  %v59_v20 = vld [vmem:[%s1170_s1 + $0xf8] sm:$0xff] }
  0x14   :  { %703 = vmatprep.subr.bf16.mxu1 %v702_v56  ;;  %v41_v15 = vld [vmem:[%s1170_s1 + $0x68] sm:$0xff]  ;;  %201 = vmatprep.mubr.f32.mxu0 %v22_v12  ;;  %v24_v21 = vld [vmem:[%s1169_s0 + $0x18] sm:$0xff]  ;;  %v90_v22 = vld [vmem:[%s1170_s1 + $0x1f0] sm:$0xff]  ;;  %v682_v26 = vpack.c.bf16 %v59_v20, %v58_v19 }
  0x15   :  { %673 = vmatpush3.bf16.msra.mxu0 %v672_v62  ;;  %v73_v17 = vld [vmem:[%s1170_s1 + $0x168] sm:$0xff]  ;;  %v91_v23 = vld [vmem:[%s1170_s1 + $0x1f8] sm:$0xff]  ;;  %271 = vmatprep.mubr.f32.mxu1 %v24_v21  ;;  %v680_v24 = vpack.c.bf16 %v41_v15, %v40_v11  ;;  %v42_v27 = vld [vmem:[%s1170_s1 + $0x70] sm:$0xff] }
  0x16   :  { %675 = vmatprep.subr.bf16.mxu0 %v674_v0  ;;  %v712_v25 = vpack.c.bf16 %v73_v17, %v72_v16  ;;  %v43_v28 = vld [vmem:[%s1170_s1 + $0x78] sm:$0xff]  ;;  %v74_v29 = vld [vmem:[%s1170_s1 + $0x170] sm:$0xff]  ;;  %v714_v30 = vpack.c.bf16 %v91_v23, %v90_v22  ;;  %v108_v32 = vld [vmem:[%s1170_s1 + $0x280] sm:$0xff] }
  0x17   :  { %705 = vmatpush3.bf16.msra.mxu1 %v704_v63  ;;  %v75_v31 = vld [vmem:[%s1170_s1 + $0x178] sm:$0xff]  ;;  %v109_v33 = vld [vmem:[%s1170_s1 + $0x288] sm:$0xff]  ;;  %v684_v34 = vpack.c.bf16 %v43_v28, %v42_v27  ;;  %v92_v37 = vld [vmem:[%s1170_s1 + $0x200] sm:$0xff] }
  0x18   :  { %707 = vmatprep.subr.bf16.mxu1 %v706_v4  ;;  %v716_v35 = vpack.c.bf16 %v75_v31, %v74_v29  ;;  %v718_v36 = vpack.c.bf16 %v109_v33, %v108_v32  ;;  %v93_v38 = vld [vmem:[%s1170_s1 + $0x208] sm:$0xff]  ;;  %v110_v39 = vld [vmem:[%s1170_s1 + $0x290] sm:$0xff]  ;;  %v111_v40 = vld [vmem:[%s1170_s1 + $0x298] sm:$0xff] }
  0x19   :  { %677 = vmatpush3.bf16.msra.mxu0 %v676_v10  ;;  %v21_v41 = vld [vmem:[%s1169_s0] sm:$0xff]  ;;  %v720_v42 = vpack.c.bf16 %v93_v38, %v92_v37  ;;  %v23_v43 = vld [vmem:[%s1169_s0 + $0x10] sm:$0xff]  ;;  %v722_v45 = vpack.c.bf16 %v111_v40, %v110_v39  ;;  %v95_v46 = vld [vmem:[%s1170_s1 + $0x218] sm:$0xff] }
  0x1a   :  { %679 = vmatprep.subr.bf16.mxu0 %v678_v14  ;;  %v94_v44 = vld [vmem:[%s1170_s1 + $0x210] sm:$0xff]  ;;  %v112_v47 = vld [vmem:[%s1170_s1 + $0x2a0] sm:$0xff]  ;;  %v113_v48 = vld [vmem:[%s1170_s1 + $0x2a8] sm:$0xff] }
  0x1b   :  { %709 = vmatpush3.bf16.msra.mxu1 %v708_v13  ;;  %v26_v49 = vld [vmem:[%s1169_s0 + $0x28] sm:$0xff]  ;;  %v124_v51 = vld [vmem:[%s1170_s1 + $0x300] sm:$0xff] }
  0x1c   :  { %711 = vmatprep.subr.bf16.mxu1 %v710_v18  ;;  %v125_v52 = vld [vmem:[%s1170_s1 + $0x308] sm:$0xff] }
  0x1d   :  { %681 = vmatpush3.bf16.msra.mxu0 %v680_v24  ;;  %v751_v53 = vpack.c.bf16 %v125_v52, %v124_v51 }
  0x1e   :  { %683 = vmatprep.subr.bf16.mxu0 %v682_v26 }
  0x1f   :  { %713 = vmatpush3.bf16.msra.mxu1 %v712_v25 }
  0x20   :  { %715 = vmatprep.subr.bf16.mxu1 %v714_v30 }
  0x21   :  { %685 = vmatpush3.bf16.msra.mxu0 %v684_v34 }
  0x22   :  { %719 = vmatprep.subr.bf16.mxu0 %v718_v36 }
  0x23   :  { %717 = vmatpush3.bf16.msra.mxu1 %v716_v35 }
  0x24   :  { %750 = vmatprep.subr.bf16.mxu1 %v787_v50  ;;  %202 = vmatmul.mubr.f32.vlgmr.msra.gmra.mrb[0].mxu0 %v21_v41 }
  0x25   :  { %10 = vsyncpa [#allocation3], 0  ;;  %721 = vmatpush3.bf16.msra.mxu0 %v720_v42  ;;  %v724_v54 = vpack.c.bf16 %v95_v46, %v94_v44  ;;  %v726_v55 = vpack.c.bf16 %v113_v48, %v112_v47  ;;  %v96_v56 = vld [vmem:[%s1170_s1 + $0x220] sm:$0xff]  ;;  %v97_v57 = vld [vmem:[%s1170_s1 + $0x228] sm:$0xff]  ;;  %341 = vmatprep.mubr.f32.mxu0 %v26_v49  ;;  %vm788_vm0 = vmmov 0   ;;  %v789_v60 = vmov 0.0  }
  0x26   :  { %272 = vmatmul.mubr.f32.vlgmr.msra.gmra.mrb[0].mxu1 %v23_v43  ;;  %723 = vmatprep.subr.bf16.mxu0 %v722_v45  ;;  %v114_v58 = vld [vmem:[%s1170_s1 + $0x2b0] sm:$0xff]  ;;  %v115_v59 = vld [vmem:[%s1170_s1 + $0x2b8] sm:$0xff]  ;;  %vm133_vm1 = vcmask 130048   ;;  %v728_v62 = vpack.c.bf16 %v97_v57, %v96_v56  ;;  %v116_v2 = vld [vmem:[%s1170_s1 + $0x2c0] sm:$0xff]  ;;  %vm429_vm2 = vcmask 261120   ;;  %vm503_vm3 = vcmask 80896  }
  0x27   :  { %752 = vmatpush3.bf16.msra.mxu1 %v751_v53  ;;  %640 = vmatprep.mubr.msk.f32.mxu1 %vm788_vm0, %v789_v60  ;;  %v27_v61 = vld [vmem:[%s1169_s0 + $0x30] sm:$0xff]  ;;  %v730_v63 = vpack.c.bf16 %v115_v59, %v114_v58  ;;  %v99_v1 = vld [vmem:[%s1170_s1 + $0x238] sm:$0xff]  ;;  %v117_v3 = vld [vmem:[%s1170_s1 + $0x2c8] sm:$0xff] }
  0x28   :  { %753 = vmatprep.subr.bf16.mxu1 %v787_v50  ;;  %v98_v0 = vld [vmem:[%s1170_s1 + $0x230] sm:$0xff]  ;;  %v734_v5 = vpack.c.bf16 %v117_v3, %v116_v2  ;;  %v100_v6 = vld [vmem:[%s1170_s1 + $0x240] sm:$0xff]  ;;  %v101_v7 = vld [vmem:[%s1170_s1 + $0x248] sm:$0xff] }
  0x29   :  { %725 = vmatpush3.bf16.msra.mxu0 %v724_v54  ;;  %v732_v4 = vpack.c.bf16 %v99_v1, %v98_v0  ;;  %v118_v8 = vld [vmem:[%s1170_s1 + $0x2d0] sm:$0xff]  ;;  %v119_v9 = vld [vmem:[%s1170_s1 + $0x2d8] sm:$0xff]  ;;  %v736_v10 = vpack.c.bf16 %v101_v7, %v100_v6  ;;  %v120_v14 = vld [vmem:[%s1170_s1 + $0x2e0] sm:$0xff] }
  0x2a   :  { %727 = vmatprep.subr.bf16.mxu0 %v726_v55  ;;  %641 = vmatmul.mubr.msk.f32.vlgmr.msra.gmra.mrb[2].mxu1 %vm133_vm1, %v27_v61  ;;  %v738_v11 = vpack.c.bf16 %v119_v9, %v118_v8  ;;  %v102_v12 = vld [vmem:[%s1170_s1 + $0x250] sm:$0xff]  ;;  %v103_v13 = vld [vmem:[%s1170_s1 + $0x258] sm:$0xff]  ;;  %v121_v15 = vld [vmem:[%s1170_s1 + $0x2e8] sm:$0xff] }
  0x2b   :  { %651 = vmatprep.mubr.msk.f32.mxu1 %vm788_vm0, %v789_v60  ;;  %v740_v16 = vpack.c.bf16 %v103_v13, %v102_v12  ;;  %v742_v17 = vpack.c.bf16 %v121_v15, %v120_v14  ;;  %v104_v18 = vld [vmem:[%s1170_s1 + $0x260] sm:$0xff]  ;;  %v105_v19 = vld [vmem:[%s1170_s1 + $0x268] sm:$0xff]  ;;  %v122_v20 = vld [vmem:[%s1170_s1 + $0x2f0] sm:$0xff] }
  0x2c   :  { %v123_v21 = vld [vmem:[%s1170_s1 + $0x2f8] sm:$0xff]  ;;  %v744_v22 = vpack.c.bf16 %v105_v19, %v104_v18  ;;  %v106_v24 = vld [vmem:[%s1170_s1 + $0x270] sm:$0xff]  ;;  %v25_v27 = vld [vmem:[%s1169_s0 + $0x20] sm:$0xff] }
  0x2d   :  { %729 = vmatpush3.bf16.msra.mxu0 %v728_v62  ;;  %v746_v23 = vpack.c.bf16 %v123_v21, %v122_v20  ;;  %v107_v25 = vld [vmem:[%s1170_s1 + $0x278] sm:$0xff]  ;;  %v418_v28 = vld [vmem:[%s1172_s3] sm:$0xff]  ;;  %v419_v29 = vld [vmem:[%s1172_s3 + $0x8] sm:$0xff] }
  0x2e   :  { %731 = vmatprep.subr.bf16.mxu0 %v730_v63  ;;  %v748_v26 = vpack.c.bf16 %v107_v25, %v106_v24  ;;  %v754_v30 = vpack.c.bf16 %v419_v29, %v418_v28  ;;  %v420_v31 = vld [vmem:[%s1172_s3 + $0x10] sm:$0xff]  ;;  %v421_v32 = vld [vmem:[%s1172_s3 + $0x18] sm:$0xff]  ;;  %v519_v35 = vld [vmem:[%s1171_s2] ss:$0 sm:$0xff]  ;;  %s790_s2 = smov [#allocation2]  }
  0x2f   :  { %v757_v33 = vpack.c.bf16 %v421_v32, %v420_v31  ;;  %v521_v51 = vld [vmem:[%s1173_s4] ss:$0 sm:$0xff]  ;;  %s511_s12 = sshll.u32 %s790_s2, 4  ;;  %s512_s12 = int_to_ptr.vmem [resolvable:$true] %s511_s12 }
  0x30   :  { %755 = vmatpush3.bf16.msra.mxu1 %v754_v30  ;;  %s763_s13 = scalar_lea.vmem %s512_s12, 128  ;;  %p768_p1 = scmp.lt.s32.totalorder %s512_s12, %s512_s12 }
  0x31   :  { %733 = vmatpush3.bf16.msra.mxu0 %v732_v4  ;;  %756 = vmatprep.subr.bf16.mxu1 %v787_v50  ;;  %p764_p0 = scmp.ne.s32.totalorder %s512_s12, %s763_s13  ;;  %p769_p2 = scmp.lt.s32.totalorder %s763_s13, %s763_s13 }
  0x32   :  { %735 = vmatprep.subr.bf16.mxu0 %v734_v5 }
  0x33   :  { %p770_p3 = por %p769_p2, %p768_p1 }
  0x34   :  { %758 = vmatpush3.bf16.msra.mxu1 %v757_v33 }
  0x35   :  { %737 = vmatpush3.bf16.msra.mxu0 %v736_v10  ;;  %p771_p4 = pnand %p770_p3, %p764_p0 }
  0x36   :  { %739 = vmatprep.subr.bf16.mxu0 %v738_v11 }
  0x39   :  { %741 = vmatpush3.bf16.msra.mxu0 %v740_v16 }
  0x3a   :  { %743 = vmatprep.subr.bf16.mxu0 %v742_v17 }
  0x3d   :  { %745 = vmatpush3.bf16.msra.mxu0 %v744_v22 }
  0x3e   :  { %747 = vmatprep.subr.bf16.mxu0 %v746_v23 }
  0x41   :  { %749 = vmatpush3.bf16.msra.mxu0 %v748_v26 }
  0x44   :  { %342 = vmatmul.mubr.f32.vlgmr.msra.gmra.mrb[2].mxu0 %v25_v27 }
  0xf7   :  { %v555_v34 = vpop.f32.mrb[0].mxu0 }
  0xf8   :  { %v556_v36 = vpop.f32.mrb[1].mxu0 }
  0xf9   :  { %v590_v37 = vpop.f32.mrb[0].mxu1  ;;  %v557_v38 = vadd.f32 %v556_v36, %v555_v34 }
  0xfa   :  { %v591_v39 = vpop.f32.mrb[1].mxu1 }
  0xfb   :  { %v592_v40 = vadd.f32 %v591_v39, %v590_v37  ;;  %v204_v41 = vadd.f32 %v557_v38, %v519_v35 }
  0xfd   :  { %v274_v42 = vadd.f32 %v592_v40, %v204_v41  ;;  %v413_v43 = vpop.f32.mrb[2].mxu1 }
  0xfe   :  { %v642_v44 = vpop.f32.mrb[3].mxu1 }
 0x117   :  { %v625_v45 = vpop.f32.mrb[2].mxu0 }
 0x118   :  { %v626_v46 = vpop.f32.mrb[3].mxu0 }
 0x119   :  { %v627_v47 = vadd.f32 %v626_v46, %v625_v45 }
 0x11b   :  { %v344_v48 = vadd.f32 %v627_v47, %v274_v42 }
 0x11d   :  { %v414_v49 = vadd.f32 %v413_v43, %v344_v48 }
 0x11f   :  { %v417_v50 = vmax.f32 %v414_v49, 0.0 }
 0x121   :  { %652 = vmatmul.mubr.msk.f32.vlgmr.msra.gmra.mrb[4].mxu1 %vm429_vm2, %v417_v50 }
 0x1f4   :  { %v499_v52 = vpop.f32.mrb[4].mxu1 }
 0x1f5   :  { %v500_v53 = vadd.f32 %v521_v51, %v499_v52  ;;  %v653_v54 = vpop.f32.mrb[5].mxu1 }
 0x1f7   :  { %504 = vst.msk [vmem:[#allocation2] sm:$0xff] %vm503_vm3, %v500_v53 }
 0x1f8   :  { %774 = shalt.err (!%p771_p4)
}
 0x1f9   :  { %s775_s16 = scalar_lea.hbm %s1174_s5, 128 }
 0x1fa   :  { %p776_p5 = scmp.ne.s32.totalorder %s1174_s5, %s775_s16  ;;  %p779_p6 = scmp.lt.u32.totalorder %s775_s16, %s1174_s5 }
 0x1fc   :  { %p781_p7 = pnand %p779_p6, %p776_p5 }
 0x1fe   :  { %784 = shalt.err (!%p781_p7)
}
 0x1ff   :  { %514 = dma.vmem_to_hbm [thread:$0]  %s512_s12, 128, %s1174_s5, [#allocation3]  }
 0x200   :  { %785 = dma.done.wait [#allocation3], 128  }
 0x201   :  { %786 = vsyncadd [#allocation3], 4294967168 }
 0x202   :  { %518 = vsyncpa [#allocation3], 1 }

</bundles_post_ra>
